<compile_context>
chip_gen: v5e
topology: v5e:2x2
jax: 0.10.0
libtpu: 0.0.40
codegen_flags: <defaults>
</compile_context>

<pallas_src>
import jax
import jax.numpy as jnp
from jax import lax
from jax.experimental import pallas as pl
from jax.experimental.pallas import tpu as pltpu
import numpy as np


_BLUR_W = 1.0 / 25.0
_SOBEL = ((1.0, 0.0, -1.0),
          (2.0, 0.0, -2.0),
          (1.0, 0.0, -1.0))


def edges_kernel(x_ref, mask_ref, o_ref):
    # x_ref   : (Gb, H+6, Wp)  packed, zero-padded input planes
    #            (image k interior at rows [3,3+H), cols [k*(W+6)+3, ...+W))
    # mask_ref: (H+2, Wp-4)    1/25 on each image's blur interior, 0 on the
    #                          conv_edges pad=1 ring and on the lane gaps
    # o_ref   : (Gb, H, Wp-6)  packed |grad| (image k at cols [k*(W+6), ...+W))
    _, Hp, Wp = x_ref.shape
    H = Hp - 6
    Hb, Wb, Wd = H + 2, Wp - 4, Wp - 6

    xp = x_ref[...].astype(jnp.float32)                               # (Gb, H+6, Wp)

    # --- separable 5x5 box blur on the packed padded plane (1/25 folded into mask)
    hb = (xp[:, :, 0:Wb] + xp[:, :, 1:Wb + 1] + xp[:, :, 2:Wb + 2]
          + xp[:, :, 3:Wb + 3] + xp[:, :, 4:Wb + 4])                  # (Gb, H+6, Wb)
    blur = (hb[:, 0:Hb] + hb[:, 1:Hb + 1] + hb[:, 2:Hb + 2]
            + hb[:, 3:Hb + 3] + hb[:, 4:Hb + 4])                      # (Gb, H+2, Wb)

    # --- conv_edges zero-pads the blurred HxW maps (pad=1): one vmul with a
    #     constant mask imposes the zero ring (and zeroes the inter-image gaps).
    bp = blur * mask_ref[...]                                         # (Gb, H+2, Wb)

    # --- separable Sobel: gx = [1 2 1]^T (x) [1 0 -1], gy = its transpose
    dh = bp[:, :, 0:Wd] - bp[:, :, 2:Wd + 2]                          # (Gb, H+2, Wd)
    sh = bp[:, :, 0:Wd] + 2.0 * bp[:, :, 1:Wd + 1] + bp[:, :, 2:Wd + 2]
    gx = dh[:, 0:H] + 2.0 * dh[:, 1:H + 1] + dh[:, 2:H + 2]           # (Gb, H, Wd)
    gy = sh[:, 0:H] - sh[:, 2:H + 2]                                  # (Gb, H, Wd)

    o_ref[...] = jnp.sqrt(gx * gx + gy * gy).astype(o_ref.dtype)


def _plane_bytes(Hp, Wp):
    """f32 footprint of one (Hp, Wp) packed plane after (8,128) tiling."""
    return (pl.cdiv(Hp, 8) * 8) * (pl.cdiv(Wp, 128) * 128) * 4


def _vmem_policy():
    """(vmem_limit_cap, per-block budget) — generation aware."""
    try:
        cap = getattr(pltpu.get_tpu_info(), "vmem_capacity_bytes", 128 << 20)
    except Exception:
        cap = 128 << 20
    if cap <= (64 << 20):            # v7x: 64 MiB physical -> leave compiler headroom
        return 48 << 20, 2 << 20
    return 100 << 20, 4 << 20        # v5e / v6e: 128 MiB physical


def _pick_group_block(G, group_bytes, budget_bytes):
    """Groups per grid step: fit the budget, but keep >= 2 steps when G >= 2
    (DMA/compute overlap; lets v7x shard the parallel axis over 2 TCs)."""
    cap = max(1, budget_bytes // max(12 * group_bytes, 1))   # ~12 plane-sized live values
    if G >= 2:
        cap = min(cap, G // 2)
    best = 1
    for d in range(1, G + 1):
        if G % d == 0 and d <= cap:
            best = d
    return best


def edges_forward(x):
    """x: (N, 1, H, W) float32, NCHW.  Returns (N, 1, H, W)."""
    N, C, H, W = x.shape
    assert C == 1, "Edges expects a single input channel"
    dtype = x.dtype

    # --- lane packing factor: floor(128 / (W+6)) images per packed plane.
    S = W + 6
    P = min(max(1, 128 // S), N)
    Np = pl.cdiv(N, P) * P
    G = Np // P
    Hp, Wp = H + 6, P * S
    Wb, Wd = Wp - 4, Wp - 6

    # --- build the packed, zero-padded planes wrapper-side (one fused XLA copy):
    #     image n = g*P + k interior sits at rows [3, 3+H), cols [k*S+3, k*S+3+W).
    x2 = x[:, 0]                                              # (N, H, W)
    if Np > N:
        x2 = jnp.concatenate([x2, jnp.zeros((Np - N, H, W), dtype)], axis=0)
    xpk = jnp.pad(x2.reshape(G, P, H, W), ((0, 0), (0, 0), (3, 3), (3, 3)))
    xpk = xpk.transpose(0, 2, 1, 3).reshape(G, Hp, Wp)        # (G, H+6, P*(W+6))

    # --- constant mask: 1/25 on blur interiors, 0 on the pad=1 ring & lane gaps.
    mask_np = np.zeros((H + 2, Wb), np.float32)
    for k in range(P):
        mask_np[1:H + 1, k * S + 1:k * S + 1 + W] = _BLUR_W
    mask = jnp.asarray(mask_np)

    vmem_cap, blk_budget = _vmem_policy()
    Gb = _pick_group_block(G, _plane_bytes(Hp, Wp), blk_budget)
    vmem_limit = int(min(vmem_cap, max(32 << 20, 16 * Gb * _plane_bytes(Hp, Wp))))

    out = pl.pallas_call(
        edges_kernel,
        out_shape=jax.ShapeDtypeStruct((G, H, Wd), dtype),
        grid_spec=pltpu.PrefetchScalarGridSpec(
            num_scalar_prefetch=0,
            grid=(G // Gb,),
            in_specs=[pl.BlockSpec((Gb, Hp, Wp), lambda g: (g, 0, 0)),
                      pl.BlockSpec((H + 2, Wb), lambda g: (0, 0))],
            out_specs=pl.BlockSpec((Gb, H, Wd), lambda g: (g, 0, 0)),
        ),
        compiler_params=pltpu.CompilerParams(
            dimension_semantics=("parallel",),
            vmem_limit_bytes=vmem_limit),
    )(xpk, mask)

    # --- unpack: image k of group g sits at output cols [k*S, k*S+W).
    out = jnp.pad(out, ((0, 0), (0, 0), (0, 6))).reshape(G, H, P, S)[..., :W]
    out = out.transpose(0, 2, 1, 3).reshape(Np, H, W)[:N]
    return out[:, None, :, :]                                 # (N, 1, H, W)


def _edges_reference(x):
    """Pure-JAX reference using lax conv, mirroring the PyTorch module."""
    blur_w = jnp.full((1, 1, 5, 5), _BLUR_W, jnp.float32)
    sob = jnp.array(_SOBEL, jnp.float32)
    edge_w = jnp.stack([sob[None], sob.T[None]], axis=0)      # (2,1,3,3)
    dn = ("NCHW", "OIHW", "NCHW")
    b = lax.conv_general_dilated(x, blur_w, (1, 1), ((2, 2), (2, 2)),
                                 dimension_numbers=dn)
    e = lax.conv_general_dilated(b, edge_w, (1, 1), ((1, 1), (1, 1)),
                                 dimension_numbers=dn)
    gx, gy = e[:, 0:1], e[:, 1:2]
    return jnp.sqrt(gx * gx + gy * gy)


if __name__ == "__main__":
    key = jax.random.PRNGKey(0)
    # small primary shape + odd sizes + a batch that forces padding/multi-step grid
    for shape in [(4, 1, 16, 16), (3, 1, 17, 23), (7, 1, 16, 16)]:
        key, sub = jax.random.split(key)
        x = jax.random.normal(sub, shape, dtype=jnp.float32)

        out = jax.block_until_ready(edges_forward(x))
        ref = jax.block_until_ready(_edges_reference(x))

        assert out.shape == shape
        np.testing.assert_allclose(np.asarray(out), np.asarray(ref),
                                   rtol=1e-4, atol=1e-4)
    print("KERNEL_OK")
</pallas_src>

<mosaic_0001>
module attributes {stable_mosaic.version = 11 : i64} {
  func.func @edges_kernel(%arg0: i32, %arg1: memref<1x22x88xf32, #tpu.memory_space<vmem>>, %arg2: memref<18x84xf32, #tpu.memory_space<vmem>>, %arg3: memref<1x16x82xf32, #tpu.memory_space<vmem>>) attributes {dimension_semantics = [#tpu.dimension_semantics<parallel>], iteration_bounds = array<i64: 1>, scalar_prefetch = 0 : i64, scratch_operands = 0 : i64, tpu.core_type = #tpu.core_type<tc>, window_params = [{transform_indices = @transform_0, window_bounds = array<i64: 1, 22, 88>}, {pipeline_mode = #tpu.pipeline_mode<synchronous>, transform_indices = @transform_1, window_bounds = array<i64: 18, 84>}, {transform_indices = @transform_2, window_bounds = array<i64: 1, 16, 82>}]} {
    %c0 = arith.constant 0 : index
    %c0_0 = arith.constant 0 : index
    %c0_1 = arith.constant 0 : index
    %0 = vector.load %arg1[%c0, %c0_0, %c0_1] : memref<1x22x88xf32, #tpu.memory_space<vmem>>, vector<1x22x88xf32>
    %1 = vector.extract_strided_slice %0 {offsets = [0, 0, 0], sizes = [1, 22, 84], strides = [1, 1, 1]} : vector<1x22x88xf32> to vector<1x22x84xf32>
    %2 = vector.extract_strided_slice %0 {offsets = [0, 0, 1], sizes = [1, 22, 84], strides = [1, 1, 1]} : vector<1x22x88xf32> to vector<1x22x84xf32>
    %3 = arith.addf %1, %2 : vector<1x22x84xf32>
    %4 = vector.extract_strided_slice %0 {offsets = [0, 0, 2], sizes = [1, 22, 84], strides = [1, 1, 1]} : vector<1x22x88xf32> to vector<1x22x84xf32>
    %5 = arith.addf %3, %4 : vector<1x22x84xf32>
    %6 = vector.extract_strided_slice %0 {offsets = [0, 0, 3], sizes = [1, 22, 84], strides = [1, 1, 1]} : vector<1x22x88xf32> to vector<1x22x84xf32>
    %7 = arith.addf %5, %6 : vector<1x22x84xf32>
    %8 = vector.extract_strided_slice %0 {offsets = [0, 0, 4], sizes = [1, 22, 84], strides = [1, 1, 1]} : vector<1x22x88xf32> to vector<1x22x84xf32>
    %9 = arith.addf %7, %8 : vector<1x22x84xf32>
    %10 = vector.extract_strided_slice %9 {offsets = [0, 0, 0], sizes = [1, 18, 84], strides = [1, 1, 1]} : vector<1x22x84xf32> to vector<1x18x84xf32>
    %11 = vector.extract_strided_slice %9 {offsets = [0, 1, 0], sizes = [1, 18, 84], strides = [1, 1, 1]} : vector<1x22x84xf32> to vector<1x18x84xf32>
    %12 = arith.addf %10, %11 : vector<1x18x84xf32>
    %13 = vector.extract_strided_slice %9 {offsets = [0, 2, 0], sizes = [1, 18, 84], strides = [1, 1, 1]} : vector<1x22x84xf32> to vector<1x18x84xf32>
    %14 = arith.addf %12, %13 : vector<1x18x84xf32>
    %15 = vector.extract_strided_slice %9 {offsets = [0, 3, 0], sizes = [1, 18, 84], strides = [1, 1, 1]} : vector<1x22x84xf32> to vector<1x18x84xf32>
    %16 = arith.addf %14, %15 : vector<1x18x84xf32>
    %17 = vector.extract_strided_slice %9 {offsets = [0, 4, 0], sizes = [1, 18, 84], strides = [1, 1, 1]} : vector<1x22x84xf32> to vector<1x18x84xf32>
    %18 = arith.addf %16, %17 : vector<1x18x84xf32>
    %c0_2 = arith.constant 0 : index
    %c0_3 = arith.constant 0 : index
    %19 = vector.load %arg2[%c0_2, %c0_3] : memref<18x84xf32, #tpu.memory_space<vmem>>, vector<18x84xf32>
    %20 = vector.shape_cast %19 : vector<18x84xf32> to vector<1x18x84xf32>
    %21 = arith.mulf %18, %20 : vector<1x18x84xf32>
    %22 = vector.extract_strided_slice %21 {offsets = [0, 0, 0], sizes = [1, 18, 82], strides = [1, 1, 1]} : vector<1x18x84xf32> to vector<1x18x82xf32>
    %23 = vector.extract_strided_slice %21 {offsets = [0, 0, 2], sizes = [1, 18, 82], strides = [1, 1, 1]} : vector<1x18x84xf32> to vector<1x18x82xf32>
    %24 = arith.subf %22, %23 : vector<1x18x82xf32>
    %25 = vector.extract_strided_slice %21 {offsets = [0, 0, 0], sizes = [1, 18, 82], strides = [1, 1, 1]} : vector<1x18x84xf32> to vector<1x18x82xf32>
    %26 = vector.extract_strided_slice %21 {offsets = [0, 0, 1], sizes = [1, 18, 82], strides = [1, 1, 1]} : vector<1x18x84xf32> to vector<1x18x82xf32>
    %cst = arith.constant 2.000000e+00 : f32
    %27 = vector.broadcast %cst : f32 to vector<1x18x82xf32>
    %28 = arith.mulf %27, %26 : vector<1x18x82xf32>
    %29 = arith.addf %25, %28 : vector<1x18x82xf32>
    %30 = vector.extract_strided_slice %21 {offsets = [0, 0, 2], sizes = [1, 18, 82], strides = [1, 1, 1]} : vector<1x18x84xf32> to vector<1x18x82xf32>
    %31 = arith.addf %29, %30 : vector<1x18x82xf32>
    %32 = vector.extract_strided_slice %24 {offsets = [0, 0, 0], sizes = [1, 16, 82], strides = [1, 1, 1]} : vector<1x18x82xf32> to vector<1x16x82xf32>
    %33 = vector.extract_strided_slice %24 {offsets = [0, 1, 0], sizes = [1, 16, 82], strides = [1, 1, 1]} : vector<1x18x82xf32> to vector<1x16x82xf32>
    %cst_4 = arith.constant 2.000000e+00 : f32
    %34 = vector.broadcast %cst_4 : f32 to vector<1x16x82xf32>
    %35 = arith.mulf %34, %33 : vector<1x16x82xf32>
    %36 = arith.addf %32, %35 : vector<1x16x82xf32>
    %37 = vector.extract_strided_slice %24 {offsets = [0, 2, 0], sizes = [1, 16, 82], strides = [1, 1, 1]} : vector<1x18x82xf32> to vector<1x16x82xf32>
    %38 = arith.addf %36, %37 : vector<1x16x82xf32>
    %39 = vector.extract_strided_slice %31 {offsets = [0, 0, 0], sizes = [1, 16, 82], strides = [1, 1, 1]} : vector<1x18x82xf32> to vector<1x16x82xf32>
    %40 = vector.extract_strided_slice %31 {offsets = [0, 2, 0], sizes = [1, 16, 82], strides = [1, 1, 1]} : vector<1x18x82xf32> to vector<1x16x82xf32>
    %41 = arith.subf %39, %40 : vector<1x16x82xf32>
    %42 = arith.mulf %38, %38 : vector<1x16x82xf32>
    %43 = arith.mulf %41, %41 : vector<1x16x82xf32>
    %44 = arith.addf %42, %43 : vector<1x16x82xf32>
    %45 = math.sqrt %44 : vector<1x16x82xf32>
    %c0_5 = arith.constant 0 : index
    %c0_6 = arith.constant 0 : index
    %c0_7 = arith.constant 0 : index
    %46 = vector.load %arg3[%c0_5, %c0_6, %c0_7] : memref<1x16x82xf32, #tpu.memory_space<vmem>>, vector<1x16x82xf32>
    tpu.vector_store %arg3[%c0_5, %c0_6, %c0_7], %45 {strides = array<i32>} : memref<1x16x82xf32, #tpu.memory_space<vmem>>, vector<1x16x82xf32>,
    return
  }
  func.func @transform_0(%arg0: i32) -> (i32, i32, i32) {
    %c0_i32 = arith.constant 0 : i32
    %c0_i32_0 = arith.constant 0 : i32
    %c0_i32_1 = arith.constant 0 : i32
    return %arg0, %c0_i32, %c0_i32_0 : i32, i32, i32
  }
  func.func @transform_1(%arg0: i32) -> (i32, i32) {
    %c0_i32 = arith.constant 0 : i32
    %c0_i32_0 = arith.constant 0 : i32
    %c0_i32_1 = arith.constant 0 : i32
    return %c0_i32, %c0_i32_0 : i32, i32
  }
  func.func @transform_2(%arg0: i32) -> (i32, i32, i32) {
    %c0_i32 = arith.constant 0 : i32
    %c0_i32_0 = arith.constant 0 : i32
    %c0_i32_1 = arith.constant 0 : i32
    return %arg0, %c0_i32, %c0_i32_0 : i32, i32, i32
  }
}

</mosaic_0001>

<bundles_post_ra>
// kernel: tpu_custom_call.1
= control target key start
LH: loop header
LB: loop body
LE: loop exit
PB: predicated region body
PF: predicated region fallthrough
CT: control target
= control target key end

     0   :  { %s286_s15 = smov 127   ;;  %s351_s0 = inlined_call_operand.vmem [shape: f32[1,22,88], index: 0, kind: input, shape index: {}]   ;;  %s352_s1 = inlined_call_operand.vmem [shape: f32[18,84], index: 1, kind: input, shape index: {}]   ;;  %s353_s2 = inlined_call_operand.hbm [shape: f32[1,16,82], index: 2, kind: output, shape index: {}]  }
   0x1   :  { %v14_v0 = vld [vmem:[%s351_s0 + $0x10] sm:$0x3f]  ;;  %v12_v1 = vld [vmem:[%s351_s0] sm:$0xff]  ;;  %v13_v2 = vld [vmem:[%s351_s0 + $0x8] sm:$0xff] }
   0x2   :  { %22 = vrot.lane.b32.xlu1 %v14_v0, %s286_s15  ;;  %18 = vrot.lane.b32.xlu0 %v12_v1, %s286_s15 }
   0x3   :  { %7 = vsyncpa [#allocation3], 0  ;;  %s287_s16 = smov 126   ;;  %s288_s17 = smov 125   ;;  %v119_v24 = vld [vmem:[%s352_s1 + $0x10] sm:$0x3] }
   0x4   :  { %32 = vrot.lane.b32.xlu2 %v13_v2, %s287_s16  ;;  %s289_s0 = smov 124   ;;  %vm69_vm0 = vcmask 1046528   ;;  %vm81_vm1 = vcmask 1045504   ;;  %vm93_vm2 = vcmask 1044480   ;;  %vm105_vm3 = vcmask 1043456   ;;  %v118_v58 = vld [vmem:[%s352_s1 + $0x8] sm:$0xff] }
   0x5   :  { %v117_v62 = vld [vmem:[%s352_s1] sm:$0xff]  ;;  %s290_s1 = smov [#allocation2]   ;;  %s237_s27 = sshll.u32 %s353_s2, 4  ;;  %vm228_vm5 = vcmask 670720   ;;  %s238_s27 = int_to_ptr.hbm [resolvable:$true] %s237_s27 }
   0x6   :  { %s235_s24 = sshll.u32 %s290_s1, 4  ;;  %s291_s28 = smov 128   ;;  %s236_s24 = int_to_ptr.vmem [resolvable:$true] %s235_s24 }
   0x7   :  { %s292_s29 = smov 8  }
   0xa   :  { %30 = vrot.lane.b32.xlu1 %v12_v1, %s287_s16  ;;  %20 = vrot.lane.b32.xlu0 %v13_v2, %s286_s15 }
   0xc   :  { %34 = vrot.lane.b32.xlu2 %v14_v0, %s287_s16 }
  0x12   :  { %44 = vrot.lane.b32.xlu1 %v13_v2, %s288_s17  ;;  %42 = vrot.lane.b32.xlu0 %v12_v1, %s288_s17 }
  0x14   :  { %46 = vrot.lane.b32.xlu2 %v14_v0, %s288_s17 }
  0x1a   :  { %56 = vrot.lane.b32.xlu1 %v13_v2, %s289_s0  ;;  %54 = vrot.lane.b32.xlu0 %v12_v1, %s289_s0 }
  0x1c   :  { %58 = vrot.lane.b32.xlu2 %v14_v0, %s289_s0 }
  0x5e   :  { %v33_v3 = vpop.permute.xlu2 %32 }
  0x66   :  { %v35_v4 = vpop.permute.xlu2 %34 }
  0x6e   :  { %v47_v5 = vpop.permute.xlu2 %46 }
  0x74   :  { %v23_v6 = vpop.permute.xlu1 %22  ;;  %v19_v7 = vpop.permute.xlu0 %18 }
  0x75   :  { %v29_v8 = vadd.f32 %v23_v6, %v14_v0  ;;  %v27_v27 = vadd.f32 %v19_v7, %v12_v1 }
  0x76   :  { %v59_v10 = vpop.permute.xlu2 %58 }
  0x77   :  { %v41_v9 = vadd.f32 %v35_v4, %v29_v8 }
  0x79   :  { %v53_v11 = vadd.f32 %v47_v5, %v41_v9 }
  0x7b   :  { %v65_v12 = vadd.f32 %v59_v10, %v53_v11 }
  0x7c   :  { %v31_v13 = vpop.permute.xlu1 %30  ;;  %v21_v14 = vpop.permute.xlu0 %20 }
  0x7d   :  { %v73_v15 = vrot.slane %v65_v12, 1  ;;  %v85_v17 = vrot.slane %v65_v12, 2  ;;  %v97_v18 = vrot.slane %v65_v12, 3  ;;  %v109_v21 = vrot.slane %v65_v12, 4 }
  0x7e   :  { %v28_v25 = vadd.f32 %v21_v14, %v13_v2  ;;  %v39_v29 = vadd.f32 %v31_v13, %v27_v27 }
  0x7f   :  { %v80_v16 = vadd.f32 %v73_v15, %v65_v12 }
  0x80   :  { %v40_v30 = vadd.f32 %v33_v3, %v28_v25 }
  0x81   :  { %v92_v19 = vadd.f32 %v85_v17, %v80_v16 }
  0x83   :  { %v104_v20 = vadd.f32 %v97_v18, %v92_v19 }
  0x84   :  { %v45_v22 = vpop.permute.xlu1 %44  ;;  %v43_v23 = vpop.permute.xlu0 %42 }
  0x85   :  { %v116_v26 = vadd.f32 %v109_v21, %v104_v20  ;;  %v52_v31 = vadd.f32 %v45_v22, %v40_v30  ;;  %v51_v32 = vadd.f32 %v43_v23, %v39_v29 }
  0x87   :  { %v122_v28 = vmul.f32 %v119_v24, %v116_v26 }
  0x89   :  { %130 = vrot.lane.b32.xlu2 %v122_v28, %s287_s16  ;;  %v140_v39 = vmul.f32 2.0, %v122_v28 }
  0x8c   :  { %v57_v33 = vpop.permute.xlu1 %56  ;;  %v55_v34 = vpop.permute.xlu0 %54 }
  0x8d   :  { %v64_v35 = vadd.f32 %v57_v33, %v52_v31  ;;  %v63_v36 = vadd.f32 %v55_v34, %v51_v32 }
  0x8f   :  { %v71_v37 = vrot.slane %v64_v35, 1  ;;  %v83_v38 = vrot.slane %v64_v35, 2  ;;  %v70_v40 = vrot.slane %v63_v36, 1  ;;  %v82_v41 = vrot.slane %v63_v36, 2 }
  0x90   :  { %v95_v43 = vrot.slane %v64_v35, 3  ;;  %v94_v46 = vrot.slane %v63_v36, 3  ;;  %v107_v47 = vrot.slane %v64_v35, 4  ;;  %v106_v50 = vrot.slane %v63_v36, 4 }
  0x91   :  { %v74_v42 = vsel %vm69_vm0, %v71_v37, %v73_v15  ;;  %148 = vrot.lane.b32.xlu2 %v140_v39, %s286_s15  ;;  %v72_v45 = vsel %vm69_vm0, %v70_v40, %v71_v37  ;;  %v86_v49 = vsel %vm81_vm1, %v83_v38, %v85_v17  ;;  %v84_v52 = vsel %vm81_vm1, %v82_v41, %v83_v38 }
  0x92   :  { %v79_v44 = vadd.f32 %v74_v42, %v64_v35  ;;  %v78_v48 = vadd.f32 %v72_v45, %v63_v36  ;;  %v98_v53 = vsel %vm93_vm2, %v95_v43, %v97_v18  ;;  %v96_v56 = vsel %vm93_vm2, %v94_v46, %v95_v43 }
  0x93   :  { %v110_v57 = vsel %vm105_vm3, %v107_v47, %v109_v21  ;;  %v108_v61 = vsel %vm105_vm3, %v106_v50, %v107_v47 }
  0x94   :  { %v91_v51 = vadd.f32 %v86_v49, %v79_v44  ;;  %v90_v54 = vadd.f32 %v84_v52, %v78_v48 }
  0x96   :  { %v103_v55 = vadd.f32 %v98_v53, %v91_v51  ;;  %v102_v59 = vadd.f32 %v96_v56, %v90_v54 }
  0x98   :  { %v115_v60 = vadd.f32 %v110_v57, %v103_v55  ;;  %v114_v63 = vadd.f32 %v108_v61, %v102_v59 }
  0x9a   :  { %v121_v0 = vmul.f32 %v118_v58, %v115_v60  ;;  %v120_v1 = vmul.f32 %v117_v62, %v114_v63 }
  0x9c   :  { %128 = vrot.lane.b32.xlu1 %v121_v0, %s287_s16  ;;  %126 = vrot.lane.b32.xlu0 %v120_v1, %s287_s16  ;;  %v139_v2 = vmul.f32 2.0, %v121_v0  ;;  %v138_v3 = vmul.f32 2.0, %v120_v1 }
  0xa4   :  { %146 = vrot.lane.b32.xlu1 %v139_v2, %s286_s15  ;;  %144 = vrot.lane.b32.xlu0 %v138_v3, %s286_s15 }
  0xe3   :  { %v131_v4 = vpop.permute.xlu2 %130 }
  0xe4   :  { %v137_v5 = vsub.f32 %v122_v28, %v131_v4 }
  0xe6   :  { %v161_v7 = vmul.f32 2.0, %v137_v5  ;;  %v180_v29 = vrot.slane %v137_v5, 2 }
  0xe8   :  { %v168_v14 = vrot.slane %v161_v7, 1 }
  0xeb   :  { %v149_v10 = vpop.permute.xlu2 %148 }
  0xec   :  { %v155_v15 = vadd.f32 %v149_v10, %v122_v28 }
  0xee   :  { %v158_v21 = vadd.f32 %v155_v15, %v131_v4 }
  0xf0   :  { %v192_v33 = vrot.slane %v158_v21, 2 }
 0x10e   :  { %v129_v6 = vpop.permute.xlu1 %128  ;;  %v127_v9 = vpop.permute.xlu0 %126 }
 0x10f   :  { %v136_v8 = vsub.f32 %v121_v0, %v129_v6  ;;  %v135_v11 = vsub.f32 %v120_v1, %v127_v9 }
 0x111   :  { %v160_v12 = vmul.f32 2.0, %v136_v8  ;;  %v159_v13 = vmul.f32 2.0, %v135_v11  ;;  %v178_v22 = vrot.slane %v136_v8, 2  ;;  %v177_v26 = vrot.slane %v135_v11, 2 }
 0x113   :  { %v166_v16 = vrot.slane %v160_v12, 1  ;;  %v165_v17 = vrot.slane %v159_v13, 1  ;;  %v181_v28 = vsel %vm81_vm1, %v178_v22, %v180_v29  ;;  %v179_v36 = vsel %vm81_vm1, %v177_v26, %v178_v22 }
 0x115   :  { %v169_v18 = vsel %vm69_vm0, %v166_v16, %v168_v14  ;;  %v167_v19 = vsel %vm69_vm0, %v165_v17, %v166_v16 }
 0x116   :  { %v147_v20 = vpop.permute.xlu1 %146  ;;  %v145_v24 = vpop.permute.xlu0 %144  ;;  %v173_v25 = vadd.f32 %v169_v18, %v136_v8  ;;  %v172_v30 = vadd.f32 %v167_v19, %v135_v11 }
 0x117   :  { %v154_v23 = vadd.f32 %v147_v20, %v121_v0  ;;  %v153_v27 = vadd.f32 %v145_v24, %v120_v1 }
 0x118   :  { %v185_v35 = vadd.f32 %v181_v28, %v173_v25  ;;  %v184_v38 = vadd.f32 %v179_v36, %v172_v30 }
 0x119   :  { %v157_v31 = vadd.f32 %v154_v23, %v129_v6  ;;  %v156_v32 = vadd.f32 %v153_v27, %v127_v9 }
 0x11a   :  { %v199_v43 = vmul.f32 %v185_v35, %v185_v35  ;;  %v198_v45 = vmul.f32 %v184_v38, %v184_v38 }
 0x11b   :  { %v190_v34 = vrot.slane %v157_v31, 2  ;;  %v189_v37 = vrot.slane %v156_v32, 2 }
 0x11d   :  { %v193_v39 = vsel %vm81_vm1, %v190_v34, %v192_v33  ;;  %v191_v41 = vsel %vm81_vm1, %v189_v37, %v190_v34 }
 0x11e   :  { %v197_v40 = vsub.f32 %v157_v31, %v193_v39  ;;  %v196_v42 = vsub.f32 %v156_v32, %v191_v41 }
 0x120   :  { %v201_v44 = vmul.f32 %v197_v40, %v197_v40  ;;  %v200_v46 = vmul.f32 %v196_v42, %v196_v42 }
 0x122   :  { %v203_v47 = vadd.f32 %v201_v44, %v199_v43  ;;  %v202_v48 = vadd.f32 %v200_v46, %v198_v45 }
 0x124   :  { %256 = vrsqrt.f32 %v203_v47  ;;  %vm223_vm4 = vcmp.eq.f32.partialorder %v203_v47, inf  ;;  %v226_v63 = vand.u32 2147483648, %v203_v47  ;;  %vm211_vm6 = vcmp.eq.f32.partialorder %v202_v48, inf }
 0x125   :  { %258 = vrsqrt.f32 %v202_v48  ;;  %v214_v0 = vand.u32 2147483648, %v202_v48  ;;  %vm225_vm7 = vcmp.eq.f32.partialorder %v203_v47, 0.0  ;;  %vm213_vm8 = vcmp.eq.f32.partialorder %v202_v48, 0.0 }
 0x12a   :  { %v257_v49 = vpop.eup %256 }
 0x12b   :  { %v259_v50 = vpop.eup %258  ;;  %v217_v51 = vmul.f32 %v257_v49, %v203_v47 }
 0x12c   :  { %v205_v52 = vmul.f32 %v259_v50, %v202_v48 }
 0x12d   :  { %v218_v53 = vmul.f32 %v257_v49, %v217_v51 }
 0x12e   :  { %v206_v54 = vmul.f32 %v259_v50, %v205_v52 }
 0x12f   :  { %v219_v55 = vmul.f32 0.5, %v218_v53 }
 0x130   :  { %v207_v56 = vmul.f32 0.5, %v206_v54 }
 0x131   :  { %v220_v57 = vsub.f32 1.5, %v219_v55 }
 0x132   :  { %v208_v58 = vsub.f32 1.5, %v207_v56 }
 0x133   :  { %v221_v59 = vmul.f32 %v257_v49, %v220_v57 }
 0x134   :  { %v209_v60 = vmul.f32 %v259_v50, %v208_v58 }
 0x135   :  { %v222_v61 = vmul.f32 %v221_v59, %v203_v47 }
 0x136   :  { %v210_v62 = vmul.f32 %v209_v60, %v202_v48 }
 0x137   :  { %v224_v1 = vsel %vm223_vm4, %v203_v47, %v222_v61 }
 0x138   :  { %v212_v2 = vsel %vm211_vm6, %v202_v48, %v210_v62  ;;  %v227_v3 = vsel %vm225_vm7, %v226_v63, %v224_v1 }
 0x139   :  { %v215_v4 = vsel %vm213_vm8, %v214_v0, %v212_v2  ;;  %230 = vst.msk [vmem:[#allocation2 + $0x8] sm:$0xff] %vm228_vm5, %v227_v3 }
 0x13a   :  { %229 = vst.msk [vmem:[#allocation2] sm:$0xff] %vm228_vm5, %v215_v4 }
 0x13b   :  { %243 = dma.vmem_to_hbm [thread:$0]  %s236_s24, 256, %s238_s27, [#allocation3], %s291_s28, %s291_s28, %s292_s29  }
 0x13c   :  { %284 = dma.done.wait [#allocation3], 256  }
 0x13d   :  { %285 = vsyncadd [#allocation3], 4294967040 }
 0x13e   :  { %248 = vsyncpa [#allocation3], 1 }

</bundles_post_ra>
